<compile_context>
chip_gen: v7x
topology: tpu7x:2x2x1
jax: 0.10.0
libtpu: 0.0.40
codegen_flags: <defaults>
</compile_context>

<pallas_src>
import functools
import math

import jax
import jax.numpy as jnp
from jax import lax
from jax.experimental import pallas as pl
from jax.experimental.pallas import tpu as pltpu


# Contract the last axis of both operands (i.e. A @ B.T) without an explicit
# transpose — the MXU consumes the transposed operand natively.
_CONTRACT_LAST = (((1,), (1,)), ((), ()))

_TILE_BYTES = 4 * 1024 * 1024      # target f32 output-tile size (double-buffered)
_VMEM_BUDGET = 28 * 1024 * 1024    # stay under the 32 MiB scoped-VMEM default


def decoder_logits_kernel(ci_ref, cj_ref, out_ref):
    """One (TM, TN) tile of adj = sigmoid(C_i @ C_j.T)."""
    logits = lax.dot_general(ci_ref[...], cj_ref[...], _CONTRACT_LAST,
                             preferred_element_type=jnp.float32)
    # sigmoid(x) = 0.5 * tanh(0.5 x) + 0.5 : one EUP op + cheap VALU mul/add.
    out_ref[...] = (0.5 * jnp.tanh(0.5 * logits) + 0.5).astype(out_ref.dtype)


def _round_up(x: int, m: int) -> int:
    return (x + m - 1) // m * m


def _choose_tiles(n: int, d: int, in_itemsize: int):
    """Pick (tm, tn, n_rows, n_cols) for the (n x n) adjacency output."""
    n_rows = _round_up(n, 128)

    # ---- column tiling (lane axis of the output): keep stores lane-dense ----
    # Prefer full-width tiles: the output tile is then fully contiguous in HBM.
    full_width_ok = (n_rows <= 4096
                     and 2 * n_rows * d * in_itemsize <= 12 * 1024 * 1024)
    if full_width_ok:
        tn, n_cols = n_rows, n_rows
    else:
        for cand in (4096, 2048, 1024, 512):
            if n_rows % cand == 0:
                tn, n_cols = cand, n_rows
                break
        else:
            tn = 512
            n_cols = _round_up(n, 512)   # bounded column padding, 512-wide stores

    # ---- row tiling: sublane axis only needs a multiple of 8 ----
    tm_cap = min(512, max(8, (_TILE_BYTES // 4) // tn))
    tm_cap -= tm_cap % 8
    tm = 128
    for cand in range(tm_cap, 7, -8):
        if n_rows % cand == 0:
            tm = cand
            break

    # Keep the whole double-buffered working set under the scoped-VMEM default.
    def footprint(tm_, tn_):
        return 2 * (tm_ * tn_ * 4 + (tm_ + tn_) * d * in_itemsize)

    while footprint(tm, tn) > _VMEM_BUDGET and tm > 8 and tm % 16 == 0:
        tm //= 2

    # Give both v7x TensorCores work when the problem would otherwise be 1 tile.
    if (n_rows // tm) * (n_cols // tn) == 1 and tm % 16 == 0:
        tm //= 2

    return tm, tn, n_rows, n_cols


@functools.partial(jax.jit, static_argnames=("matmul_dtype",))
def decoder_forward(node_embed: jax.Array, de_weight: jax.Array,
                    *, matmul_dtype=jnp.bfloat16) -> jax.Array:
    """adj = sigmoid((node_embed @ de_weight.T) @ (node_embed @ de_weight.T).T)."""
    N, D = node_embed.shape
    assert de_weight.shape == (D, D)

    # Projection hoisted out of the tile grid: a single (N,D)x(D,D) matmul,
    # negligible next to the N^2 D logits matmul. Full-precision passes.
    combine = jnp.dot(node_embed, de_weight.T,
                      precision=lax.Precision.HIGHEST,
                      preferred_element_type=jnp.float32)

    in_itemsize = jnp.dtype(matmul_dtype).itemsize
    tm, tn, n_rows, n_cols = _choose_tiles(N, D, in_itemsize)
    n_pad = max(n_rows, n_cols)

    c = combine.astype(matmul_dtype)
    if n_pad != N:
        # Padded rows are zero -> padded logits 0 -> sigmoid 0.5, sliced away.
        c = jnp.zeros((n_pad, D), matmul_dtype).at[:N, :].set(c)

    grid = (n_rows // tm, n_cols // tn)

    cost = pl.CostEstimate(
        flops=2 * n_rows * n_cols * D,
        transcendentals=n_rows * n_cols,  # one tanh per output element
        bytes_accessed=(4 * n_rows * n_cols
                        + in_itemsize * D * (grid[1] * n_rows + grid[0] * n_cols)),
    )

    adj = pl.pallas_call(
        decoder_logits_kernel,
        out_shape=jax.ShapeDtypeStruct((n_rows, n_cols), jnp.float32),
        grid=grid,
        in_specs=[
            pl.BlockSpec((tm, D), lambda i, j: (i, 0)),   # row tile of combine
            pl.BlockSpec((tn, D), lambda i, j: (j, 0)),   # col tile of combine
        ],
        out_specs=pl.BlockSpec((tm, tn), lambda i, j: (i, j)),
        compiler_params=pltpu.CompilerParams(
            dimension_semantics=("parallel", "parallel"),
            vmem_limit_bytes=32 * 1024 * 1024,
        ),
        cost_estimate=cost,
    )(c, c)

    return adj[:N, :N]


def init_decoder_params(key: jax.Array, nembed: int) -> jax.Array:
    # Mirror reset_parameters(): uniform(-stdv, stdv), stdv = 1/sqrt(nembed)
    stdv = 1.0 / math.sqrt(nembed)
    return jax.random.uniform(
        key, (nembed, nembed), dtype=jnp.float32, minval=-stdv, maxval=stdv
    )


if __name__ == "__main__":
    key = jax.random.PRNGKey(0)
    k_x, k_w, k_x2 = jax.random.split(key, 3)

    def reference(x, w):
        c = jnp.dot(x, w.T, precision=lax.Precision.HIGHEST)
        return jax.nn.sigmoid(jnp.dot(c, c.T, precision=lax.Precision.HIGHEST))

    NEMBED = 32
    de_weight = init_decoder_params(k_w, NEMBED)

    # Case 1: small shapes consistent with the module (N nodes, nembed dim).
    N = 8
    node_embed = jax.random.normal(k_x, (N, NEMBED), dtype=jnp.float32)
    ref = reference(node_embed, de_weight)

    # f32 MXU operands: validates kernel structure with tight tolerance.
    out_f32 = jax.block_until_ready(
        decoder_forward(node_embed, de_weight, matmul_dtype=jnp.float32))
    assert out_f32.shape == (N, N)
    assert jnp.allclose(out_f32, ref, atol=2e-3, rtol=2e-3)

    # Default path: bf16 MXU operands, f32 accumulation (looser tolerance).
    out_bf16 = jax.block_until_ready(decoder_forward(node_embed, de_weight))
    assert out_bf16.shape == (N, N)
    assert jnp.allclose(out_bf16, ref, atol=1e-2, rtol=1e-2)

    # Case 2: non-multiple-of-128 N — exercises padding and a multi-tile grid.
    N2 = 300
    node_embed2 = jax.random.normal(k_x2, (N2, NEMBED), dtype=jnp.float32)
    ref2 = reference(node_embed2, de_weight)
    out2 = jax.block_until_ready(decoder_forward(node_embed2, de_weight))
    assert out2.shape == (N2, N2)
    assert jnp.allclose(out2, ref2, atol=1e-2, rtol=1e-2)

    print("KERNEL_OK")
</pallas_src>

<mosaic_0001>
module attributes {stable_mosaic.version = 11 : i64} {
  func.func @decoder_logits_kernel(%arg0: i32, %arg1: i32, %arg2: memref<64x32xf32, #tpu.memory_space<vmem>>, %arg3: memref<128x32xf32, #tpu.memory_space<vmem>>, %arg4: memref<64x128xf32, #tpu.memory_space<vmem>>) attributes {dimension_semantics = [#tpu.dimension_semantics<parallel>, #tpu.dimension_semantics<parallel>], iteration_bounds = array<i64: 2, 1>, scalar_prefetch = 0 : i64, scratch_operands = 0 : i64, tpu.core_type = #tpu.core_type<tc>, window_params = [{transform_indices = @transform_0, window_bounds = array<i64: 64, 32>}, {transform_indices = @transform_1, window_bounds = array<i64: 128, 32>}, {transform_indices = @transform_2, window_bounds = array<i64: 64, 128>}]} {
    %c0 = arith.constant 0 : index
    %c0_0 = arith.constant 0 : index
    %0 = vector.load %arg2[%c0, %c0_0] : memref<64x32xf32, #tpu.memory_space<vmem>>, vector<64x32xf32>
    %c0_1 = arith.constant 0 : index
    %c0_2 = arith.constant 0 : index
    %1 = vector.load %arg3[%c0_1, %c0_2] : memref<128x32xf32, #tpu.memory_space<vmem>>, vector<128x32xf32>
    %cst = arith.constant dense<0.000000e+00> : vector<64x128xf32>
    %2 = tpu.matmul %0, %1, %cst {dimension_numbers = #tpu.dot_dimension_numbers<[1], [1], [0], [0], [0, 0, 1, 0], [], []>} : vector<64x32xf32>, vector<128x32xf32>, vector<64x128xf32> -> vector<64x128xf32>
    %cst_3 = arith.constant 5.000000e-01 : f32
    %3 = vector.broadcast %cst_3 : f32 to vector<64x128xf32>
    %4 = arith.mulf %3, %2 : vector<64x128xf32>
    %5 = math.tanh %4 : vector<64x128xf32>
    %cst_4 = arith.constant 5.000000e-01 : f32
    %6 = vector.broadcast %cst_4 : f32 to vector<64x128xf32>
    %7 = arith.mulf %6, %5 : vector<64x128xf32>
    %cst_5 = arith.constant 5.000000e-01 : f32
    %8 = vector.broadcast %cst_5 : f32 to vector<64x128xf32>
    %9 = arith.addf %7, %8 : vector<64x128xf32>
    %c0_6 = arith.constant 0 : index
    %c0_7 = arith.constant 0 : index
    %10 = vector.load %arg4[%c0_6, %c0_7] : memref<64x128xf32, #tpu.memory_space<vmem>>, vector<64x128xf32>
    tpu.vector_store %arg4[%c0_6, %c0_7], %9 {strides = array<i32>} : memref<64x128xf32, #tpu.memory_space<vmem>>, vector<64x128xf32>,
    return
  }
  func.func @transform_0(%arg0: i32, %arg1: i32) -> (i32, i32) {
    %c0_i32 = arith.constant 0 : i32
    %c0_i32_0 = arith.constant 0 : i32
    return %arg0, %c0_i32 : i32, i32
  }
  func.func @transform_1(%arg0: i32, %arg1: i32) -> (i32, i32) {
    %c0_i32 = arith.constant 0 : i32
    %c0_i32_0 = arith.constant 0 : i32
    return %arg1, %c0_i32 : i32, i32
  }
  func.func @transform_2(%arg0: i32, %arg1: i32) -> (i32, i32) {
    %c0_i32 = arith.constant 0 : i32
    return %arg0, %arg1 : i32, i32
  }
}

</mosaic_0001>

<bundles_post_ra>
// kernel: decoder_forward.1
= control target key start
LH: loop header
LB: loop body
LE: loop exit
PB: predicated region body
PF: predicated region fallthrough
CT: control target
= control target key end

     0   :  { %s768_s9 = smov 0   ;;  %s770_s10 = smov 0   ;;  %s944_s0 = inlined_call_operand.vmem [shape: f32[128,32], index: 0, kind: input, shape index: {}, may-alias: {0,1}]   ;;  %s945_s1 = inlined_call_operand.vmem [shape: f32[128,32], index: 1, kind: input, shape index: {}, may-alias: {0,1}]   ;;  %s946_s2 = inlined_call_operand.vmem [shape: f32[128,128], index: 2, kind: output, shape index: {}]  }
   0x1   :  { %s772_s11 = smov 0  }
   0x2 LB: > { %s24_s12 = sadd.s32 1, %s747_s10  ;;  %p526_p0 = scmp.ge.s32.totalorder %s751_s11, 1  ;;  %s751_s11 = sphi %s772_s11, %s12_s11   ;;  %s747_s10 = sphi %s770_s10, %s950_s10   ;;  %s743_s9 = sphi %s768_s9, %s949_s9  }
   0x3   : > { %p26_p1 = scmp.ge.s32.totalorder %s24_s12, 2  ;;  %p138_p2 = scmp.lt.s32.totalorder %s751_s11, 3 }
   0x5   : > { %s952_s12 = smov (%p26_p1, %s24_s12), 0  ;;  %p139_p3 = pnand %p526_p0, %p138_p2 }
   0x6   : > { %v197_v0 = vld [vmem:[%s945_s1] sm:$0xff] (!%p139_p3)  ;;  %v198_v1 = vld [vmem:[%s945_s1 + $0x8] sm:$0xff] (!%p139_p3)  ;;  %vm213_vm0 = vcmask (!%p139_p3), 261120   ;;  %v199_v2 = vld [vmem:[%s945_s1 + $0x10] sm:$0xff] (!%p139_p3)  ;;  %s527_s19 = sshll.u32 (!%p139_p3), %s743_s9, 3 }
   0x7   : > { %142 = sbr.rel (%p139_p3) target bundleno = 310 (0x136), region = 28  ;;  %v625_v3 = vpack.c.bf16 (!%p139_p3), %v198_v1, %v197_v0  ;;  %vm797_vm1 = vmpackc.low (!%p139_p3), %vm213_vm0, %vm213_vm0  ;;  %v200_v5 = vld [vmem:[%s945_s1 + $0x18] sm:$0xff] (!%p139_p3)  ;;  %p169_p4 = scmp.lt.s32.totalorder (!%p139_p3), %s527_s19, 15  ;;  %v201_v7 = vld [vmem:[%s945_s1 + $0x20] sm:$0xff] (!%p139_p3) }
   0x8   : > { %v631_v6 = vpack.c.bf16 (!%p139_p3), %v200_v5, %v199_v2  ;;  %v202_v8 = vld [vmem:[%s945_s1 + $0x28] sm:$0xff] (!%p139_p3)  ;;  %v203_v12 = vld [vmem:[%s945_s1 + $0x30] sm:$0xff] (!%p139_p3)  ;;  %v204_v13 = vld [vmem:[%s945_s1 + $0x38] sm:$0xff] (!%p139_p3) }
   0x9   : > { %627 = vmatprep.subr.msk.bf16.mxu0 (!%p139_p3), %vm797_vm1, %v625_v3  ;;  %673 = vmatprep.subr.msk.bf16.mxu1 (!%p139_p3), %vm797_vm1, %v625_v3  ;;  %v637_v11 = vpack.c.bf16 (!%p139_p3), %v202_v8, %v201_v7  ;;  %v643_v14 = vpack.c.bf16 (!%p139_p3), %v204_v13, %v203_v12  ;;  %v205_v15 = vld [vmem:[%s945_s1 + $0x40] sm:$0xff] (!%p139_p3)  ;;  %v206_v16 = vld [vmem:[%s945_s1 + $0x48] sm:$0xff] (!%p139_p3)  ;;  %v207_v18 = vld [vmem:[%s945_s1 + $0x50] sm:$0xff] (!%p139_p3) }
   0xa   : > { %630 = vmatpush3.bf16.xpose.msk.msra.mxu0 (!%p139_p3), %vm797_vm1, %v625_v3  ;;  %681 = vmatpush3.bf16.xpose.msk.msra.mxu1 (!%p139_p3), %vm797_vm1, %v625_v3  ;;  %v649_v17 = vpack.c.bf16 (!%p139_p3), %v206_v16, %v205_v15  ;;  %v208_v19 = vld [vmem:[%s945_s1 + $0x58] sm:$0xff] (!%p139_p3)  ;;  %v209_v21 = vld [vmem:[%s945_s1 + $0x60] sm:$0xff] (!%p139_p3)  ;;  %v210_v22 = vld [vmem:[%s945_s1 + $0x68] sm:$0xff] (!%p139_p3) }
   0xb   : > { %633 = vmatprep.subr.msk.bf16.mxu0 (!%p139_p3), %vm797_vm1, %v631_v6  ;;  %674 = vmatprep.subr.msk.bf16.mxu1 (!%p139_p3), %vm797_vm1, %v631_v6  ;;  %v655_v20 = vpack.c.bf16 (!%p139_p3), %v208_v19, %v207_v18  ;;  %v661_v23 = vpack.c.bf16 (!%p139_p3), %v210_v22, %v209_v21  ;;  %v211_v24 = vld [vmem:[%s945_s1 + $0x70] sm:$0xff] (!%p139_p3)  ;;  %v212_v25 = vld [vmem:[%s945_s1 + $0x78] sm:$0xff] (!%p139_p3) }
   0xc   : > { %v667_v26 = vpack.c.bf16 (!%p139_p3), %v212_v25, %v211_v24 }
   0xe   : > { %s954_s19 = smov (!%p169_p4, %s527_s19), 15 }
   0xf   : > { %s528_s22 = sshll.u32 %s954_s19, 3 }
  0x10   : > { %s830_s29 = scalar_lea.vmem %s944_s0, %s528_s22 }
  0x11   : > { %v189_v9 = vld [vmem:[%s830_s29] sm:$0xff]  ;;  %v190_v27 = vld [vmem:[%s830_s29 + $0x8] sm:$0xff]  ;;  %v191_v29 = vld [vmem:[%s830_s29 + $0x10] sm:$0xff] }
  0x12   : > { %v193_v10 = vld [vmem:[%s830_s29 + $0x20] sm:$0xff]  ;;  %613 = vmatprep.mubr.msk.f32.mxu0 %vm213_vm0, %v189_v9  ;;  %636 = vmatpush3.bf16.xpose.msk.msra.mxu0 %vm797_vm1, %v631_v6  ;;  %v194_v28 = vld [vmem:[%s830_s29 + $0x28] sm:$0xff]  ;;  %v195_v30 = vld [vmem:[%s830_s29 + $0x30] sm:$0xff] }
  0x13   : > { %619 = vmatprep.mubr.msk.f32.mxu1 %vm213_vm0, %v193_v10  ;;  %682 = vmatpush3.bf16.xpose.msk.msra.mxu1 %vm797_vm1, %v631_v6  ;;  %v192_v31 = vld [vmem:[%s830_s29 + $0x18] sm:$0xff] }
  0x14   : > { %639 = vmatprep.subr.msk.bf16.mxu0 %vm797_vm1, %v637_v11  ;;  %675 = vmatprep.subr.msk.bf16.mxu1 %vm797_vm1, %v637_v11  ;;  %v196_v32 = vld [vmem:[%s830_s29 + $0x38] sm:$0xff]  ;;  %s187_s29 = scalar_lea.vmem %s946_s2, %s528_s22 }
  0x1a   : > { %642 = vmatpush3.bf16.xpose.msk.msra.mxu0 %vm797_vm1, %v637_v11 }
  0x1b   : > { %683 = vmatpush3.bf16.xpose.msk.msra.mxu1 %vm797_vm1, %v637_v11  ;;  %645 = vmatprep.subr.msk.bf16.mxu0 %vm797_vm1, %v643_v14 }
  0x1c   : > { %676 = vmatprep.subr.msk.bf16.mxu1 %vm797_vm1, %v643_v14 }
  0x22   : > { %648 = vmatpush3.bf16.xpose.msk.msra.mxu0 %vm797_vm1, %v643_v14 }
  0x23   : > { %684 = vmatpush3.bf16.xpose.msk.msra.mxu1 %vm797_vm1, %v643_v14  ;;  %651 = vmatprep.subr.msk.bf16.mxu0 %vm797_vm1, %v649_v17 }
  0x24   : > { %677 = vmatprep.subr.msk.bf16.mxu1 %vm797_vm1, %v649_v17 }
  0x2a   : > { %654 = vmatpush3.bf16.xpose.msk.msra.mxu0 %vm797_vm1, %v649_v17 }
  0x2b   : > { %685 = vmatpush3.bf16.xpose.msk.msra.mxu1 %vm797_vm1, %v649_v17  ;;  %657 = vmatprep.subr.msk.bf16.mxu0 %vm797_vm1, %v655_v20 }
  0x2c   : > { %678 = vmatprep.subr.msk.bf16.mxu1 %vm797_vm1, %v655_v20 }
  0x32   : > { %660 = vmatpush3.bf16.xpose.msk.msra.mxu0 %vm797_vm1, %v655_v20 }
  0x33   : > { %686 = vmatpush3.bf16.xpose.msk.msra.mxu1 %vm797_vm1, %v655_v20  ;;  %663 = vmatprep.subr.msk.bf16.mxu0 %vm797_vm1, %v661_v23 }
  0x34   : > { %679 = vmatprep.subr.msk.bf16.mxu1 %vm797_vm1, %v661_v23 }
  0x3a   : > { %666 = vmatpush3.bf16.xpose.msk.msra.mxu0 %vm797_vm1, %v661_v23 }
  0x3b   : > { %687 = vmatpush3.bf16.xpose.msk.msra.mxu1 %vm797_vm1, %v661_v23  ;;  %669 = vmatprep.subr.msk.bf16.mxu0 %vm797_vm1, %v667_v26 }
  0x3c   : > { %680 = vmatprep.subr.msk.bf16.mxu1 %vm797_vm1, %v667_v26 }
  0x42   : > { %672 = vmatpush3.bf16.xpose.msk.msra.mxu0 %vm797_vm1, %v667_v26 }
  0x43   : > { %688 = vmatpush3.bf16.xpose.msk.msra.mxu1 %vm797_vm1, %v667_v26 }
  0x49   : > { %614 = vmatmul.mubr.msk.f32.vlgmr.msra.gmra.mrb[0].mxu0 %vm213_vm0, %v190_v27 }
  0x4a   : > { %620 = vmatmul.mubr.msk.f32.vlgmr.msra.gmra.mrb[0].mxu1 %vm213_vm0, %v194_v28  ;;  %616 = vmatprep.mubr.msk.f32.mxu0 %vm213_vm0, %v191_v29 }
  0x4b   : > { %622 = vmatprep.mubr.msk.f32.mxu1 %vm213_vm0, %v195_v30 }
  0x4d   : > { %617 = vmatmul.mubr.msk.f32.gmra.mrb[2].mxu0 %vm213_vm0, %v192_v31 }
  0x4e   : > { %623 = vmatmul.mubr.msk.f32.gmra.mrb[2].mxu1 %vm213_vm0, %v196_v32 }
 0x11c   : > { %v615_v33 = vpop.f32.mrb[0].mxu0 }
 0x11d   : > { %v621_v34 = vpop.f32.mrb[0].mxu1  ;;  %v392_v35 = vmul.f32 0.5, %v615_v33  ;;  %v352_v37 = vpop.f32.mrb[1].mxu0 }
 0x11e   : > { %v396_v36 = vmul.f32 0.5, %v621_v34  ;;  %v372_v38 = vpop.f32.mrb[1].mxu1  ;;  %v391_v39 = vmul.f32 0.5, %v352_v37 }
 0x11f   : > { %v395_v40 = vmul.f32 0.5, %v372_v38  ;;  %713 = vtanh.f32 %v392_v35 }
 0x120   : > { %715 = vtanh.f32 %v396_v36  ;;  %v618_v41 = vpop.f32.mrb[2].mxu0 }
 0x121   : > { %v624_v42 = vpop.f32.mrb[2].mxu1  ;;  %717 = vtanh.f32 %v391_v39  ;;  %v394_v43 = vmul.f32 0.5, %v618_v41  ;;  %v362_v45 = vpop.f32.mrb[3].mxu0 }
 0x122   : > { %v398_v44 = vmul.f32 0.5, %v624_v42  ;;  %v382_v46 = vpop.f32.mrb[3].mxu1  ;;  %719 = vtanh.f32 %v395_v40  ;;  %v393_v47 = vmul.f32 0.5, %v362_v45 }
 0x123   : > { %v397_v48 = vmul.f32 0.5, %v382_v46  ;;  %721 = vtanh.f32 %v394_v43 }
 0x124   : > { %723 = vtanh.f32 %v398_v44 }
 0x125   : > { %725 = vtanh.f32 %v393_v47 }
 0x126   : > { %727 = vtanh.f32 %v397_v48 }
 0x129   : > { %v714_v49 = vpop.eup %713 }
 0x12a   : > { %v716_v50 = vpop.eup %715  ;;  %v408_v51 = vmul.f32 0.5, %v714_v49 }
 0x12b   : > { %v718_v52 = vpop.eup %717  ;;  %v412_v53 = vmul.f32 0.5, %v716_v50 }
 0x12c   : > { %v720_v54 = vpop.eup %719  ;;  %v416_v55 = vadd.f32 0.5, %v408_v51  ;;  %v407_v56 = vmul.f32 0.5, %v718_v52 }
 0x12d   : > { %v722_v57 = vpop.eup %721  ;;  %v420_v58 = vadd.f32 0.5, %v412_v53  ;;  %v411_v59 = vmul.f32 0.5, %v720_v54 }
 0x12e   : > { %v724_v60 = vpop.eup %723  ;;  %424 = vst [vmem:[%s187_s29 + $0x8] sm:$0xff] %v416_v55  ;;  %v415_v61 = vadd.f32 0.5, %v407_v56  ;;  %v410_v62 = vmul.f32 0.5, %v722_v57 }
 0x12f   : > { %v726_v63 = vpop.eup %725  ;;  %428 = vst [vmem:[%s187_s29 + $0x28] sm:$0xff] %v420_v58  ;;  %v419_v0 = vadd.f32 0.5, %v411_v59  ;;  %v414_v1 = vmul.f32 0.5, %v724_v60 }
 0x130   : > { %v728_v2 = vpop.eup %727  ;;  %423 = vst [vmem:[%s187_s29] sm:$0xff] %v415_v61  ;;  %v418_v3 = vadd.f32 0.5, %v410_v62  ;;  %v409_v4 = vmul.f32 0.5, %v726_v63 }
 0x131   : > { %427 = vst [vmem:[%s187_s29 + $0x20] sm:$0xff] %v419_v0  ;;  %v422_v5 = vadd.f32 0.5, %v414_v1  ;;  %v413_v6 = vmul.f32 0.5, %v728_v2 }
 0x132   : > { %426 = vst [vmem:[%s187_s29 + $0x18] sm:$0xff] %v418_v3  ;;  %v417_v7 = vadd.f32 0.5, %v409_v4 }
 0x133   : > { %430 = vst [vmem:[%s187_s29 + $0x38] sm:$0xff] %v422_v5  ;;  %v421_v8 = vadd.f32 0.5, %v413_v6 }
 0x134   : > { %425 = vst [vmem:[%s187_s29 + $0x10] sm:$0xff] %v417_v7 }
 0x135   : > { %429 = vst [vmem:[%s187_s29 + $0x30] sm:$0xff] %v421_v8 }
 0x136 PF: > { %s12_s11 = sadd.s32 1, %s751_s11   ;;  %s949_s9 = smov %s747_s10 }
 0x137   : > { %p9_p5 = scmp.ge.s32.totalorder %s12_s11, 4   ;;  %s950_s10 = smov %s952_s12 }
 0x139   :  { %11 = sbr.rel (!%p9_p5) target bundleno = 2 (0x2), region = 61 }

</bundles_post_ra>
